<compile_context>
chip_gen: v7x
topology: tpu7x:2x2x1
jax: 0.10.0
libtpu: 0.0.40
codegen_flags: <defaults>
</compile_context>

<pallas_src>
import functools

import jax
import jax.numpy as jnp
from jax.experimental import pallas as pl
from jax.experimental.pallas import tpu as pltpu


def _round_up(x, m):
    return (x + m - 1) // m * m


def _cnn_kernel(emb_ref, convw_ref, convb_ref, projw_ref, projb_ref, out_ref,
                *, seq_len, window, tile_b):
    # emb_ref:   (TILE_B, T, E)   embedded tokens for this batch tile
    # convw_ref: (W, E, Fp)       conv weights, transposed + filter-padded
    # convb_ref: (1, Fp)          conv bias (f32)
    # projw_ref: (Fp, Np)         projection weights, padded
    # projb_ref: (1, Np)          projection bias (f32)
    # out_ref:   (TILE_B, Np)     dense (lane-padded) logits
    out_len = seq_len - window + 1                   # L = T - W + 1
    num_filters_p = convw_ref.shape[-1]              # Fp (multiple of 128)

    acc = jnp.zeros((tile_b, out_len, num_filters_p), dtype=jnp.float32)
    # window is small & static -> unrolled loop of batched MXU matmuls,
    # accumulated in f32.
    for w in range(window):
        lhs = emb_ref[:, pl.ds(w, out_len), :]       # (TILE_B, L, E)
        rhs = jnp.broadcast_to(convw_ref[w],
                               (tile_b,) + convw_ref.shape[1:])  # (TILE_B, E, Fp)
        acc = acc + jax.lax.dot_general(
            lhs, rhs,
            dimension_numbers=(((2,), (1,)), ((0,), (0,))),
            preferred_element_type=jnp.float32)      # (TILE_B, L, Fp)

    # max over time, then bias (exact: bias is constant over time), then ReLU
    h = jnp.max(acc, axis=1) + convb_ref[...]        # (TILE_B, Fp)
    h = jnp.maximum(h, 0.0)

    # projection layer (dense (TILE_B, Fp) x (Fp, Np) matmul)
    out = jnp.dot(h.astype(projw_ref.dtype), projw_ref[...],
                  preferred_element_type=jnp.float32) + projb_ref[...]
    out_ref[...] = out.astype(out_ref.dtype)


def cnn_forward(words, emb_table, conv_w, conv_b, proj_w, proj_b,
                *, tile_b=None, use_bf16_matmul=False):
    """words: int32 [B, T] (or [T], auto-unsqueezed like the torch module)."""
    if words.ndim < 2:
        words = words[None, :]
    B, T = words.shape
    _, E = emb_table.shape
    F, _, W = conv_w.shape          # PyTorch Conv1d weight layout: (F, E, W)
    ntags = proj_w.shape[0]         # PyTorch Linear weight layout: (ntags, F)
    assert T >= W, "sequence must be at least window_size long"

    # lane-dense padding of filter / tag dims (padded with zeros; zero filters
    # contribute zero to the padded logits, which are sliced off below)
    Fp = _round_up(F, 128)
    Np = _round_up(ntags, 128)

    # batch tile: multiple of 8, bounded by a conservative VMEM budget for the
    # double-buffered activation block (safe even on v7x's smaller VMEM).
    if tile_b is None:
        act_budget = 8 * 1024 * 1024                # bytes
        bytes_per_row = T * E * 4 * 2               # f32, double-buffered
        cap = max(8, (act_budget // bytes_per_row) // 8 * 8)
        tile_b = min(_round_up(B, 8), 128, cap)
    Bp = _round_up(B, tile_b)

    # --- glue in plain JAX: pad batch, embedding gather, weight re-layout ---
    if Bp != B:
        words = jnp.pad(words, ((0, Bp - B), (0, 0)))   # index 0 is valid
    emb = emb_table[words]                              # (Bp, T, E)

    conv_w_t = jnp.transpose(conv_w, (2, 1, 0))         # (W, E, F)
    conv_w_t = jnp.pad(conv_w_t, ((0, 0), (0, 0), (0, Fp - F)))
    conv_b_p = jnp.pad(conv_b, (0, Fp - F))[None, :].astype(jnp.float32)
    proj_w_t = jnp.transpose(proj_w, (1, 0))            # (F, ntags)
    proj_w_t = jnp.pad(proj_w_t, ((0, Fp - F), (0, Np - ntags)))
    proj_b_p = jnp.pad(proj_b, (0, Np - ntags))[None, :].astype(jnp.float32)

    mm_dtype = jnp.bfloat16 if use_bf16_matmul else jnp.float32
    emb = emb.astype(mm_dtype)
    conv_w_t = conv_w_t.astype(mm_dtype)
    proj_w_t = proj_w_t.astype(mm_dtype)

    kernel = functools.partial(_cnn_kernel, seq_len=T, window=W, tile_b=tile_b)

    out = pl.pallas_call(
        kernel,
        out_shape=jax.ShapeDtypeStruct((Bp, Np), jnp.float32),
        grid_spec=pltpu.PrefetchScalarGridSpec(
            num_scalar_prefetch=0,
            grid=(Bp // tile_b,),
            in_specs=[
                pl.BlockSpec((tile_b, T, E), lambda b: (b, 0, 0)),
                pl.BlockSpec((W, E, Fp), lambda b: (0, 0, 0)),
                pl.BlockSpec((1, Fp), lambda b: (0, 0)),
                pl.BlockSpec((Fp, Np), lambda b: (0, 0)),
                pl.BlockSpec((1, Np), lambda b: (0, 0)),
            ],
            out_specs=pl.BlockSpec((tile_b, Np), lambda b: (b, 0)),
        ),
        compiler_params=pltpu.CompilerParams(
            dimension_semantics=("parallel",)),
    )(emb, conv_w_t, conv_b_p, proj_w_t, proj_b_p)

    return out[:B, :ntags]


def _reference(words, emb_table, conv_w, conv_b, proj_w, proj_b):
    """Pure-JAX reference mirroring the PyTorch forward."""
    if words.ndim < 2:
        words = words[None, :]
    emb = emb_table[words]                          # (B, T, E)
    x = jnp.transpose(emb, (0, 2, 1))               # (B, E, T)  (NCL)
    F, E, W = conv_w.shape
    T = x.shape[-1]
    L = T - W + 1
    h = jnp.stack(
        [jnp.einsum('bet,fet->bf', x[:, :, t:t + W], conv_w) for t in range(L)],
        axis=-1) + conv_b[None, :, None]            # (B, F, L)
    h = jnp.max(h, axis=2)                          # (B, F)
    h = jnp.maximum(h, 0.0)
    return h @ proj_w.T + proj_b                    # (B, ntags)


if __name__ == "__main__":
    # small shapes consistent with the module
    nwords, emb_size, num_filters, window_size, ntags = 100, 32, 16, 3, 5
    B, T = 2, 8

    key = jax.random.PRNGKey(0)
    k_emb, k_cw, k_cb, k_pw, k_words = jax.random.split(key, 5)

    # deterministic parameter init (matching the __init__ shapes / schemes)
    emb_table = jax.random.uniform(k_emb, (nwords, emb_size),
                                   minval=-0.25, maxval=0.25,
                                   dtype=jnp.float32)
    fan_in = emb_size * window_size
    bound = 1.0 / jnp.sqrt(fan_in)
    conv_w = jax.random.uniform(k_cw, (num_filters, emb_size, window_size),
                                minval=-bound, maxval=bound, dtype=jnp.float32)
    conv_b = jax.random.uniform(k_cb, (num_filters,),
                                minval=-bound, maxval=bound, dtype=jnp.float32)
    xav = jnp.sqrt(6.0 / (num_filters + ntags))
    proj_w = jax.random.uniform(k_pw, (ntags, num_filters),
                                minval=-xav, maxval=xav, dtype=jnp.float32)
    proj_b = jnp.zeros((ntags,), dtype=jnp.float32)

    words = jax.random.randint(k_words, (B, T), 0, nwords, dtype=jnp.int32)

    out = cnn_forward(words, emb_table, conv_w, conv_b, proj_w, proj_b)
    out = jax.block_until_ready(out)

    ref = _reference(words, emb_table, conv_w, conv_b, proj_w, proj_b)
    assert out.shape == (B, ntags)
    assert jnp.allclose(out, ref, atol=1e-4, rtol=1e-4), (out, ref)

    print("KERNEL_OK")
</pallas_src>

<mosaic_0001>
module attributes {stable_mosaic.version = 11 : i64} {
  func.func @_cnn_kernel(%arg0: i32, %arg1: memref<8x8x32xf32, #tpu.memory_space<vmem>>, %arg2: memref<3x32x128xf32, #tpu.memory_space<vmem>>, %arg3: memref<1x128xf32, #tpu.memory_space<vmem>>, %arg4: memref<128x128xf32, #tpu.memory_space<vmem>>, %arg5: memref<1x128xf32, #tpu.memory_space<vmem>>, %arg6: memref<8x128xf32, #tpu.memory_space<vmem>>) attributes {dimension_semantics = [#tpu.dimension_semantics<parallel>], iteration_bounds = array<i64: 1>, scalar_prefetch = 0 : i64, scratch_operands = 0 : i64, tpu.core_type = #tpu.core_type<tc>, window_params = [{transform_indices = @transform_0, window_bounds = array<i64: 8, 8, 32>}, {pipeline_mode = #tpu.pipeline_mode<synchronous>, transform_indices = @transform_1, window_bounds = array<i64: 3, 32, 128>}, {pipeline_mode = #tpu.pipeline_mode<synchronous>, transform_indices = @transform_2, window_bounds = array<i64: 1, 128>}, {pipeline_mode = #tpu.pipeline_mode<synchronous>, transform_indices = @transform_3, window_bounds = array<i64: 128, 128>}, {pipeline_mode = #tpu.pipeline_mode<synchronous>, transform_indices = @transform_4, window_bounds = array<i64: 1, 128>}, {transform_indices = @transform_5, window_bounds = array<i64: 8, 128>}]} {
    %cst = arith.constant 0.000000e+00 : f32
    %0 = vector.broadcast %cst : f32 to vector<8x6x128xf32>
    %c0 = arith.constant 0 : index
    %c0_0 = arith.constant 0 : index
    %c0_1 = arith.constant 0 : index
    %1 = vector.load %arg1[%c0, %c0_0, %c0_1] : memref<8x8x32xf32, #tpu.memory_space<vmem>>, vector<8x6x32xf32>
    %c0_2 = arith.constant 0 : index
    %c0_3 = arith.constant 0 : index
    %c0_4 = arith.constant 0 : index
    %2 = vector.load %arg2[%c0_2, %c0_3, %c0_4] : memref<3x32x128xf32, #tpu.memory_space<vmem>>, vector<1x32x128xf32>
    %3 = vector.shape_cast %2 : vector<1x32x128xf32> to vector<32x128xf32>
    %4 = vector.shape_cast %3 : vector<32x128xf32> to vector<1x32x128xf32>
    %5 = vector.broadcast %4 : vector<1x32x128xf32> to vector<8x32x128xf32>
    %cst_5 = arith.constant dense<0.000000e+00> : vector<8x6x128xf32>
    %6 = tpu.matmul %1, %5, %cst_5 {dimension_numbers = #tpu.dot_dimension_numbers<[2], [1], [1], [2], [0, 0, 0, 1, 1, 2], [0], [0]>} : vector<8x6x32xf32>, vector<8x32x128xf32>, vector<8x6x128xf32> -> vector<8x6x128xf32>
    %7 = arith.addf %0, %6 : vector<8x6x128xf32>
    %c0_6 = arith.constant 0 : index
    %c1 = arith.constant 1 : index
    %c0_7 = arith.constant 0 : index
    %8 = vector.load %arg1[%c0_6, %c1, %c0_7] : memref<8x8x32xf32, #tpu.memory_space<vmem>>, vector<8x6x32xf32>
    %c1_8 = arith.constant 1 : index
    %c0_9 = arith.constant 0 : index
    %c0_10 = arith.constant 0 : index
    %9 = vector.load %arg2[%c1_8, %c0_9, %c0_10] : memref<3x32x128xf32, #tpu.memory_space<vmem>>, vector<1x32x128xf32>
    %10 = vector.shape_cast %9 : vector<1x32x128xf32> to vector<32x128xf32>
    %11 = vector.shape_cast %10 : vector<32x128xf32> to vector<1x32x128xf32>
    %12 = vector.broadcast %11 : vector<1x32x128xf32> to vector<8x32x128xf32>
    %cst_11 = arith.constant dense<0.000000e+00> : vector<8x6x128xf32>
    %13 = tpu.matmul %8, %12, %cst_11 {dimension_numbers = #tpu.dot_dimension_numbers<[2], [1], [1], [2], [0, 0, 0, 1, 1, 2], [0], [0]>} : vector<8x6x32xf32>, vector<8x32x128xf32>, vector<8x6x128xf32> -> vector<8x6x128xf32>
    %14 = arith.addf %7, %13 : vector<8x6x128xf32>
    %c0_12 = arith.constant 0 : index
    %c2 = arith.constant 2 : index
    %c0_13 = arith.constant 0 : index
    %15 = vector.load %arg1[%c0_12, %c2, %c0_13] : memref<8x8x32xf32, #tpu.memory_space<vmem>>, vector<8x6x32xf32>
    %c2_14 = arith.constant 2 : index
    %c0_15 = arith.constant 0 : index
    %c0_16 = arith.constant 0 : index
    %16 = vector.load %arg2[%c2_14, %c0_15, %c0_16] : memref<3x32x128xf32, #tpu.memory_space<vmem>>, vector<1x32x128xf32>
    %17 = vector.shape_cast %16 : vector<1x32x128xf32> to vector<32x128xf32>
    %18 = vector.shape_cast %17 : vector<32x128xf32> to vector<1x32x128xf32>
    %19 = vector.broadcast %18 : vector<1x32x128xf32> to vector<8x32x128xf32>
    %cst_17 = arith.constant dense<0.000000e+00> : vector<8x6x128xf32>
    %20 = tpu.matmul %15, %19, %cst_17 {dimension_numbers = #tpu.dot_dimension_numbers<[2], [1], [1], [2], [0, 0, 0, 1, 1, 2], [0], [0]>} : vector<8x6x32xf32>, vector<8x32x128xf32>, vector<8x6x128xf32> -> vector<8x6x128xf32>
    %21 = arith.addf %14, %20 : vector<8x6x128xf32>
    %cst_18 = arith.constant dense<0xFF800000> : vector<8x128xf32>
    %22 = vector.multi_reduction <maximumf>, %21, %cst_18 [1] : vector<8x6x128xf32> to vector<8x128xf32>
    %c0_19 = arith.constant 0 : index
    %c0_20 = arith.constant 0 : index
    %23 = vector.load %arg3[%c0_19, %c0_20] : memref<1x128xf32, #tpu.memory_space<vmem>>, vector<1x128xf32>
    %24 = vector.broadcast %23 : vector<1x128xf32> to vector<8x128xf32>
    %25 = arith.addf %22, %24 : vector<8x128xf32>
    %cst_21 = arith.constant 0.000000e+00 : f32
    %26 = vector.broadcast %cst_21 : f32 to vector<8x128xf32>
    %27 = arith.maximumf %25, %26 : vector<8x128xf32>
    %c0_22 = arith.constant 0 : index
    %c0_23 = arith.constant 0 : index
    %28 = vector.load %arg4[%c0_22, %c0_23] : memref<128x128xf32, #tpu.memory_space<vmem>>, vector<128x128xf32>
    %cst_24 = arith.constant dense<0.000000e+00> : vector<8x128xf32>
    %29 = tpu.matmul %27, %28, %cst_24 {dimension_numbers = #tpu.dot_dimension_numbers<[1], [0], [0], [1], [0, 0, 1, 1], [], []>} : vector<8x128xf32>, vector<128x128xf32>, vector<8x128xf32> -> vector<8x128xf32>
    %c0_25 = arith.constant 0 : index
    %c0_26 = arith.constant 0 : index
    %30 = vector.load %arg5[%c0_25, %c0_26] : memref<1x128xf32, #tpu.memory_space<vmem>>, vector<1x128xf32>
    %31 = vector.broadcast %30 : vector<1x128xf32> to vector<8x128xf32>
    %32 = arith.addf %29, %31 : vector<8x128xf32>
    %c0_27 = arith.constant 0 : index
    %c0_28 = arith.constant 0 : index
    %33 = vector.load %arg6[%c0_27, %c0_28] : memref<8x128xf32, #tpu.memory_space<vmem>>, vector<8x128xf32>
    tpu.vector_store %arg6[%c0_27, %c0_28], %32 {strides = array<i32>} : memref<8x128xf32, #tpu.memory_space<vmem>>, vector<8x128xf32>,
    return
  }
  func.func @transform_0(%arg0: i32) -> (i32, i32, i32) {
    %c0_i32 = arith.constant 0 : i32
    %c0_i32_0 = arith.constant 0 : i32
    %c0_i32_1 = arith.constant 0 : i32
    return %arg0, %c0_i32, %c0_i32_0 : i32, i32, i32
  }
  func.func @transform_1(%arg0: i32) -> (i32, i32, i32) {
    %c0_i32 = arith.constant 0 : i32
    %c0_i32_0 = arith.constant 0 : i32
    %c0_i32_1 = arith.constant 0 : i32
    %c0_i32_2 = arith.constant 0 : i32
    return %c0_i32, %c0_i32_0, %c0_i32_1 : i32, i32, i32
  }
  func.func @transform_2(%arg0: i32) -> (i32, i32) {
    %c0_i32 = arith.constant 0 : i32
    %c0_i32_0 = arith.constant 0 : i32
    %c0_i32_1 = arith.constant 0 : i32
    return %c0_i32, %c0_i32_0 : i32, i32
  }
  func.func @transform_3(%arg0: i32) -> (i32, i32) {
    %c0_i32 = arith.constant 0 : i32
    %c0_i32_0 = arith.constant 0 : i32
    %c0_i32_1 = arith.constant 0 : i32
    return %c0_i32, %c0_i32_0 : i32, i32
  }
  func.func @transform_4(%arg0: i32) -> (i32, i32) {
    %c0_i32 = arith.constant 0 : i32
    %c0_i32_0 = arith.constant 0 : i32
    %c0_i32_1 = arith.constant 0 : i32
    return %c0_i32, %c0_i32_0 : i32, i32
  }
  func.func @transform_5(%arg0: i32) -> (i32, i32) {
    %c0_i32 = arith.constant 0 : i32
    %c0_i32_0 = arith.constant 0 : i32
    return %arg0, %c0_i32 : i32, i32
  }
}

</mosaic_0001>

<bundles_post_ra>
// kernel: tpu_custom_call.1
= control target key start
LH: loop header
LB: loop body
LE: loop exit
PB: predicated region body
PF: predicated region fallthrough
CT: control target
= control target key end

     0   :  { %10 = vsyncpa [#allocation3], 0  ;;  %s3161_s0 = inlined_call_operand.hbm [shape: f32[8,8,32], index: 0, kind: input, shape index: {}]   ;;  %s3162_s1 = inlined_call_operand.hbm [shape: f32[3,32,128], index: 1, kind: input, shape index: {}]   ;;  %s3163_s2 = inlined_call_operand.vmem [shape: f32[1,128], index: 2, kind: input, shape index: {}]   ;;  %s3164_s3 = inlined_call_operand.hbm [shape: f32[128,128], index: 3, kind: input, shape index: {}]   ;;  %s3165_s4 = inlined_call_operand.vmem [shape: f32[1,128], index: 4, kind: input, shape index: {}]   ;;  %s3166_s5 = inlined_call_operand.hbm [shape: f32[8,128], index: 5, kind: output, shape index: {}]  }
   0x1   :  { %11 = vsyncpa [#allocation6], 0 }
   0x2   :  { %12 = vsyncpa [#allocation4], 0  ;;  %s2844_s18 = smov [#allocation5]   ;;  %s2845_s20 = smov [#allocation2]  }
   0x3   :  { %s30_s19 = sshll.u32 %s2844_s18, 4  ;;  %s18_s21 = sshll.u32 %s2845_s20, 4  ;;  %s31_s19 = int_to_ptr.vmem [resolvable:$true] %s30_s19  ;;  %s2883_s21 = int_to_ptr.vmem [resolvable:$true] %s18_s21 }
   0x4   :  { %s2750_s24 = scalar_lea.hbm %s3162_s1, 1536 }
   0x5   :  { %p2751_p0 = scmp.ne.s32.totalorder %s3162_s1, %s2750_s24  ;;  %p2754_p1 = scmp.lt.u32.totalorder %s2750_s24, %s3162_s1 }
   0x7   :  { %p2756_p2 = pnand %p2754_p1, %p2751_p0 }
   0x9   :  { %2759 = shalt.err (!%p2756_p2)
}
   0xa   :  { %s2760_s29 = scalar_lea.vmem %s31_s19, 1536  ;;  %p2765_p4 = scmp.lt.s32.totalorder %s31_s19, %s31_s19 }
   0xb   :  { %p2761_p3 = scmp.ne.s32.totalorder %s31_s19, %s2760_s29  ;;  %p2766_p5 = scmp.lt.s32.totalorder %s2760_s29, %s2760_s29 }
   0xd   :  { %p2767_p6 = por %p2766_p5, %p2765_p4 }
   0xf   :  { %p2768_p7 = pnand %p2767_p6, %p2761_p3 }
  0x11   :  { %2771 = shalt.err (!%p2768_p7)
}
  0x12   :  { %s2846_s30 = smov 128   ;;  %s2847_s6 = smov 8  }
  0x13   :  { %36 = dma.hbm_to_vmem [thread:$0]  %s3162_s1, 1536, %s31_s19, [#allocation6], %s2846_s30, %s2846_s30, %s2847_s6  }
  0x14   :  { %s2772_s11 = scalar_lea.hbm %s3161_s0, 1024 }
  0x15   :  { %p2773_p8 = scmp.ne.s32.totalorder %s3161_s0, %s2772_s11  ;;  %p2776_p9 = scmp.lt.u32.totalorder %s2772_s11, %s3161_s0 }
  0x17   :  { %p2778_p10 = pnand %p2776_p9, %p2773_p8 }
  0x19   :  { %2781 = shalt.err (!%p2778_p10)
}
  0x1a   :  { %s2782_s16 = scalar_lea.vmem %s2883_s21, 1024  ;;  %p2787_p12 = scmp.lt.s32.totalorder %s2883_s21, %s2883_s21 }
  0x1b   :  { %p2783_p11 = scmp.ne.s32.totalorder %s2883_s21, %s2782_s16  ;;  %p2788_p13 = scmp.lt.s32.totalorder %s2782_s16, %s2782_s16 }
  0x1d   :  { %p2789_p0 = por %p2788_p13, %p2787_p12 }
  0x1f   :  { %p2790_p1 = pnand %p2789_p0, %p2783_p11 }
  0x21   :  { %2793 = shalt.err (!%p2790_p1)
}
  0x22   :  { %24 = dma.hbm_to_vmem [thread:$0]  %s3161_s0, 1024, %s2883_s21, [#allocation3], %s2846_s30, %s2846_s30, %s2847_s6  }
  0x23   :  { %s2848_s18 = smov [#allocation7]   ;;  %s2794_s23 = scalar_lea.hbm %s3164_s3, 2048 }
  0x24   :  { %s44_s19 = sshll.u32 %s2848_s18, 4  ;;  %p2795_p2 = scmp.ne.s32.totalorder %s3164_s3, %s2794_s23  ;;  %s45_s19 = int_to_ptr.vmem [resolvable:$true] %s44_s19 }
  0x25   :  { %p2798_p3 = scmp.lt.u32.totalorder %s2794_s23, %s3164_s3 }
  0x27   :  { %p2800_p4 = pnand %p2798_p3, %p2795_p2 }
  0x29   :  { %2803 = shalt.err (!%p2800_p4)
}
  0x2a   :  { %s2804_s28 = scalar_lea.vmem %s45_s19, 2048  ;;  %p2809_p6 = scmp.lt.s32.totalorder %s45_s19, %s45_s19 }
  0x2b   :  { %p2805_p5 = scmp.ne.s32.totalorder %s45_s19, %s2804_s28  ;;  %p2810_p7 = scmp.lt.s32.totalorder %s2804_s28, %s2804_s28 }
  0x2d   :  { %p2811_p8 = por %p2810_p7, %p2809_p6 }
  0x2f   :  { %p2812_p9 = pnand %p2811_p8, %p2805_p5 }
  0x31   :  { %2815 = shalt.err (!%p2812_p9)
}
  0x32   :  { %50 = dma.hbm_to_vmem [thread:$0]  %s3164_s3, 2048, %s45_s19, [#allocation6], %s2846_s30, %s2846_s30, %s2847_s6  }
  0x33   :  { %2838 = dma.done.wait [#allocation3], 1024  }
  0x34   :  { %2839 = vsyncadd [#allocation3], 4294966272 }
  0x35   :  { %2840 = dma.done.wait [#allocation6], 3584  }
  0x36   :  { %2841 = vsyncadd [#allocation6], 4294963712  ;;  %v2849_v0 = vmov 0.0|0.0   ;;  %vm2850_vm0 = vmmov 0   ;;  %v2851_v1 = vmov 0.0   ;;  %v83_v2 = vld [vmem:[#allocation5 + $0x20] sm:$0xff] }
  0x37   :  { %2543 = vmatprep.subr.bf16.mxu1 %v2849_v0  ;;  %2567 = vmatprep.subr.bf16.mxu0 %v2849_v0  ;;  %v84_v3 = vld [vmem:[#allocation5 + $0x28] sm:$0xff]  ;;  %v85_v4 = vld [vmem:[#allocation5 + $0x30] sm:$0xff]  ;;  %v86_v6 = vld [vmem:[#allocation5 + $0x38] sm:$0xff]  ;;  %vm87_vm1 = vcmask 261120   ;;  %vm1861_vm2 = vcmask 1045504   ;;  %vm1973_vm3 = vcmask 1041409  }
  0x38   :  { %2252 = vmatprep.mubr.msk.f32.mxu1 %vm2850_vm0, %v2851_v1  ;;  %2296 = vmatprep.mubr.msk.f32.mxu0 %vm2850_vm0, %v2851_v1  ;;  %v2941_v5 = vpack.c.bf16 %v84_v3, %v83_v2  ;;  %v2945_v7 = vpack.c.bf16 %v86_v6, %v85_v4  ;;  %v74_v8 = vld [vmem:[#allocation2 + $0x1] sm:$0x3f]  ;;  %v71_v11 = vld [vmem:[#allocation5 + $0x8] sm:$0xff]  ;;  %v80_v13 = vld [vmem:[#allocation2 + $0x31] sm:$0x3f]  ;;  %vm1976_vm4 = vcmask 1042434  }
  0x39   :  { %v78_v9 = vld [vmem:[#allocation2 + $0x21] sm:$0x3f]  ;;  %v75_v12 = vld [vmem:[#allocation2 + $0x9] sm:$0x3f]  ;;  %v72_v15 = vld [vmem:[#allocation5 + $0x10] sm:$0xff]  ;;  %vm1979_vm5 = vcmask 1043459  }
  0x3a   :  { %2545 = vmatpush3.bf16.msra.mxu1 %v2941_v5  ;;  %2569 = vmatpush3.bf16.msra.mxu0 %v2941_v5  ;;  %v70_v10 = vld [vmem:[#allocation5] sm:$0xff]  ;;  %v73_v16 = vld [vmem:[#allocation5 + $0x18] sm:$0xff]  ;;  %v76_v18 = vld [vmem:[#allocation2 + $0x11] sm:$0x3f]  ;;  %vm1982_vm6 = vcmask 1044484   ;;  %vm1985_vm7 = vcmask 1045509  }
  0x3b   :  { %2546 = vmatprep.subr.bf16.mxu1 %v2849_v0  ;;  %2570 = vmatprep.subr.bf16.mxu0 %v2849_v0  ;;  %v2965_v14 = vpack.c.bf16 %v71_v11, %v70_v10  ;;  %v2973_v17 = vpack.c.bf16 %v73_v16, %v72_v15  ;;  %v62_v19 = vld [vmem:[#allocation2] sm:$0x3f]  ;;  %v77_v20 = vld [vmem:[#allocation2 + $0x19] sm:$0x3f]  ;;  %v64_v21 = vld [vmem:[#allocation2 + $0x10] sm:$0x3f] }
  0x3c   :  { %v79_v22 = vld [vmem:[#allocation2 + $0x29] sm:$0x3f]  ;;  %v66_v23 = vld [vmem:[#allocation2 + $0x20] sm:$0x3f]  ;;  %v81_v26 = vld [vmem:[#allocation2 + $0x39] sm:$0x3f] }
  0x3d   :  { %v1265_v24 = vld [vmem:[#allocation5 + $0x40] sm:$0xff]  ;;  %v1266_v25 = vld [vmem:[#allocation5 + $0x48] sm:$0xff]  ;;  %v68_v27 = vld [vmem:[#allocation2 + $0x30] sm:$0x3f]  ;;  %vm1988_vm8 = vcmask 1046534   ;;  %vm1991_vm9 = vcmask 1047559  }
  0x3e   :  { %2548 = vmatpush3.bf16.msra.mxu1 %v2945_v7  ;;  %2572 = vmatpush3.bf16.msra.mxu0 %v2945_v7  ;;  %v3025_v28 = vpack.c.bf16 %v1266_v25, %v1265_v24  ;;  %v1267_v29 = vld [vmem:[#allocation5 + $0x50] sm:$0xff]  ;;  %v1268_v30 = vld [vmem:[#allocation5 + $0x58] sm:$0xff]  ;;  %v1256_v32 = vld [vmem:[#allocation2 + $0x2] sm:$0x3f]  ;;  %s2852_s6 = smov [#allocation8]  }
  0x3f   :  { %2549 = vmatprep.subr.bf16.mxu1 %v2849_v0  ;;  %2579 = vmatprep.subr.bf16.mxu0 %v2849_v0  ;;  %v3033_v31 = vpack.c.bf16 %v1268_v30, %v1267_v29  ;;  %v63_v33 = vld [vmem:[#allocation2 + $0x8] sm:$0x3f]  ;;  %v1258_v34 = vld [vmem:[#allocation2 + $0x12] sm:$0x3f]  ;;  %v65_v35 = vld [vmem:[#allocation2 + $0x18] sm:$0x3f] }
  0x40   :  { %v1260_v36 = vld [vmem:[#allocation2 + $0x22] sm:$0x3f]  ;;  %v67_v37 = vld [vmem:[#allocation2 + $0x28] sm:$0x3f]  ;;  %v1262_v38 = vld [vmem:[#allocation2 + $0x32] sm:$0x3f] }
  0x41   :  { %2253 = vmatmul.mubr.msk.f32.vlgmr.msra.gmra.mrb[0].mxu1 %vm87_vm1, %v74_v8  ;;  %2297 = vmatmul.mubr.msk.f32.vlgmr.msra.gmra.mrb[0].mxu0 %vm87_vm1, %v78_v9  ;;  %v69_v39 = vld [vmem:[#allocation2 + $0x38] sm:$0x3f]  ;;  %v1257_v40 = vld [vmem:[#allocation2 + $0xa] sm:$0x3f]  ;;  %v1941_v44 = vld [vmem:[#allocation7] sm:$0xff]  ;;  %s2071_s7 = sshll.u32 %s2852_s6, 4  ;;  %s2072_s7 = int_to_ptr.vmem [resolvable:$true] %s2071_s7 }
  0x42   :  { %2551 = vmatpush3.bf16.msra.mxu1 %v2941_v5  ;;  %2581 = vmatpush3.bf16.msra.mxu0 %v2941_v5  ;;  %v1259_v41 = vld [vmem:[#allocation2 + $0x1a] sm:$0x3f]  ;;  %v1261_v42 = vld [vmem:[#allocation2 + $0x2a] sm:$0x3f]  ;;  %v1943_v47 = vld [vmem:[#allocation7 + $0x10] sm:$0xff]  ;;  %s2816_s8 = scalar_lea.vmem %s2072_s7, 128  ;;  %p2821_p11 = scmp.lt.s32.totalorder %s2072_s7, %s2072_s7 }
  0x43   :  { %2552 = vmatprep.subr.bf16.mxu1 %v2849_v0  ;;  %2582 = vmatprep.subr.bf16.mxu0 %v2849_v0  ;;  %v1263_v43 = vld [vmem:[#allocation2 + $0x3a] sm:$0x3f]  ;;  %v1942_v45 = vld [vmem:[#allocation7 + $0x8] sm:$0xff]  ;;  %v1945_v50 = vld [vmem:[#allocation7 + $0x20] sm:$0xff]  ;;  %p2817_p10 = scmp.ne.s32.totalorder %s2072_s7, %s2816_s8  ;;  %p2822_p12 = scmp.lt.s32.totalorder %s2816_s8, %s2816_s8 }
  0x44   :  { %2263 = vmatprep.mubr.msk.f32.mxu1 %vm2850_vm0, %v2851_v1  ;;  %2318 = vmatprep.mubr.msk.f32.mxu0 %vm2850_vm0, %v2851_v1  ;;  %v2688_v46 = vpack.c.bf16 %v1942_v45, %v1941_v44  ;;  %v1944_v48 = vld [vmem:[#allocation7 + $0x18] sm:$0xff]  ;;  %v1946_v51 = vld [vmem:[#allocation7 + $0x28] sm:$0xff]  ;;  %v1947_v53 = vld [vmem:[#allocation7 + $0x30] sm:$0xff] }
  0x45   :  { %v2691_v49 = vpack.c.bf16 %v1944_v48, %v1943_v47  ;;  %v2694_v52 = vpack.c.bf16 %v1946_v51, %v1945_v50  ;;  %v1948_v54 = vld [vmem:[#allocation7 + $0x38] sm:$0xff]  ;;  %v1949_v56 = vld [vmem:[#allocation7 + $0x40] sm:$0xff]  ;;  %v1950_v57 = vld [vmem:[#allocation7 + $0x48] sm:$0xff]  ;;  %p2823_p13 = por %p2822_p12, %p2821_p11 }
  0x46   :  { %2554 = vmatpush3.bf16.msra.mxu1 %v2945_v7  ;;  %2584 = vmatpush3.bf16.msra.mxu0 %v2945_v7  ;;  %v2697_v55 = vpack.c.bf16 %v1948_v54, %v1947_v53  ;;  %v2700_v58 = vpack.c.bf16 %v1950_v57, %v1949_v56  ;;  %v1951_v59 = vld [vmem:[#allocation7 + $0x50] sm:$0xff]  ;;  %v1952_v60 = vld [vmem:[#allocation7 + $0x58] sm:$0xff]  ;;  %v1953_v62 = vld [vmem:[#allocation7 + $0x60] sm:$0xff] }
  0x47   :  { %2555 = vmatprep.subr.bf16.mxu1 %v2849_v0  ;;  %2591 = vmatprep.subr.bf16.mxu0 %v2849_v0  ;;  %v2703_v61 = vpack.c.bf16 %v1952_v60, %v1951_v59  ;;  %v1954_v63 = vld [vmem:[#allocation7 + $0x68] sm:$0xff]  ;;  %v1955_v2 = vld [vmem:[#allocation7 + $0x70] sm:$0xff]  ;;  %v1956_v3 = vld [vmem:[#allocation7 + $0x78] sm:$0xff]  ;;  %p2824_p0 = pnand %p2823_p13, %p2817_p10 }
  0x48   :  { %v2709_v4 = vpack.c.bf16 %v1956_v3, %v1955_v2  ;;  %v3134_v50 = vld [vmem:[%s3163_s2] ss:$0 sm:$0xff] }
  0x49   :  { %2264 = vmatmul.mubr.msk.f32.vlgmr.msra.gmra.mrb[2].mxu1 %vm87_vm1, %v75_v12  ;;  %2319 = vmatmul.mubr.msk.f32.vlgmr.msra.gmra.mrb[2].mxu0 %vm87_vm1, %v80_v13 }
  0x4a   :  { %2557 = vmatpush3.bf16.msra.mxu1 %v2941_v5  ;;  %2593 = vmatpush3.bf16.msra.mxu0 %v2965_v14 }
  0x4b   :  { %2558 = vmatprep.subr.bf16.mxu1 %v2849_v0  ;;  %2594 = vmatprep.subr.bf16.mxu0 %v2849_v0 }
  0x4c   :  { %2274 = vmatprep.mubr.msk.f32.mxu1 %vm2850_vm0, %v2851_v1  ;;  %2340 = vmatprep.mubr.msk.f32.mxu0 %vm2850_vm0, %v2851_v1 }
  0x4e   :  { %2560 = vmatpush3.bf16.msra.mxu1 %v2945_v7  ;;  %2596 = vmatpush3.bf16.msra.mxu0 %v2973_v17 }
  0x4f   :  { %2561 = vmatprep.subr.bf16.mxu1 %v2849_v0  ;;  %2603 = vmatprep.subr.bf16.mxu0 %v2849_v0 }
  0x51   :  { %2275 = vmatmul.mubr.msk.f32.vlgmr.msra.gmra.mrb[4].mxu1 %vm87_vm1, %v76_v18  ;;  %2341 = vmatmul.mubr.msk.f32.vlgmr.msra.gmra.mrb[4].mxu0 %vm87_vm1, %v62_v19 }
  0x52   :  { %2563 = vmatpush3.bf16.msra.mxu1 %v2941_v5  ;;  %2605 = vmatpush3.bf16.msra.mxu0 %v2965_v14 }
  0x53   :  { %2564 = vmatprep.subr.bf16.mxu1 %v2849_v0  ;;  %2606 = vmatprep.subr.bf16.mxu0 %v2849_v0 }
  0x54   :  { %2285 = vmatprep.mubr.msk.f32.mxu1 %vm2850_vm0, %v2851_v1  ;;  %2362 = vmatprep.mubr.msk.f32.mxu0 %vm2850_vm0, %v2851_v1 }
  0x56   :  { %2566 = vmatpush3.bf16.msra.mxu1 %v2945_v7  ;;  %2608 = vmatpush3.bf16.msra.mxu0 %v2973_v17 }
  0x57   :  { %2573 = vmatprep.subr.bf16.mxu1 %v2849_v0  ;;  %2615 = vmatprep.subr.bf16.mxu0 %v2849_v0 }
  0x59   :  { %2286 = vmatmul.mubr.msk.f32.vlgmr.msra.gmra.mrb[6].mxu1 %vm87_vm1, %v77_v20  ;;  %2363 = vmatmul.mubr.msk.f32.vlgmr.msra.gmra.mrb[6].mxu0 %vm87_vm1, %v64_v21 }
  0x5a   :  { %2575 = vmatpush3.bf16.msra.mxu1 %v2941_v5  ;;  %2617 = vmatpush3.bf16.msra.mxu0 %v2965_v14 }
  0x5b   :  { %2576 = vmatprep.subr.bf16.mxu1 %v2849_v0  ;;  %2618 = vmatprep.subr.bf16.mxu0 %v2849_v0 }
  0x5c   :  { %2307 = vmatprep.mubr.msk.f32.mxu1 %vm2850_vm0, %v2851_v1  ;;  %2384 = vmatprep.mubr.msk.f32.mxu0 %vm2850_vm0, %v2851_v1 }
  0x5e   :  { %2578 = vmatpush3.bf16.msra.mxu1 %v2945_v7  ;;  %2620 = vmatpush3.bf16.msra.mxu0 %v2973_v17 }
  0x5f   :  { %2585 = vmatprep.subr.bf16.mxu1 %v2849_v0  ;;  %2627 = vmatprep.subr.bf16.mxu0 %v2849_v0 }
  0x61   :  { %2308 = vmatmul.mubr.msk.f32.vlgmr.msra.gmra.mrb[8].mxu1 %vm87_vm1, %v79_v22  ;;  %2385 = vmatmul.mubr.msk.f32.vlgmr.msra.gmra.mrb[0].mxu0 %vm87_vm1, %v66_v23 }
  0x62   :  { %2587 = vmatpush3.bf16.msra.mxu1 %v2941_v5  ;;  %2629 = vmatpush3.bf16.msra.mxu0 %v2965_v14 }
  0x63   :  { %2588 = vmatprep.subr.bf16.mxu1 %v2849_v0  ;;  %2630 = vmatprep.subr.bf16.mxu0 %v2849_v0 }
  0x64   :  { %2329 = vmatprep.mubr.msk.f32.mxu1 %vm2850_vm0, %v2851_v1  ;;  %2406 = vmatprep.mubr.msk.f32.mxu0 %vm2850_vm0, %v2851_v1 }
  0x66   :  { %2590 = vmatpush3.bf16.msra.mxu1 %v2945_v7  ;;  %2632 = vmatpush3.bf16.msra.mxu0 %v2973_v17 }
  0x67   :  { %2597 = vmatprep.subr.bf16.mxu1 %v2849_v0  ;;  %2639 = vmatprep.subr.bf16.mxu0 %v2849_v0 }
  0x69   :  { %2330 = vmatmul.mubr.msk.f32.vlgmr.msra.gmra.mrb[10].mxu1 %vm87_vm1, %v81_v26  ;;  %2407 = vmatmul.mubr.msk.f32.vlgmr.msra.gmra.mrb[2].mxu0 %vm87_vm1, %v68_v27 }
  0x6a   :  { %2599 = vmatpush3.bf16.msra.mxu1 %v2965_v14  ;;  %2641 = vmatpush3.bf16.msra.mxu0 %v3025_v28 }
  0x6b   :  { %2600 = vmatprep.subr.bf16.mxu1 %v2849_v0  ;;  %2642 = vmatprep.subr.bf16.mxu0 %v2849_v0 }
  0x6c   :  { %2428 = vmatprep.mubr.msk.f32.mxu0 %vm2850_vm0, %v2851_v1  ;;  %2351 = vmatprep.mubr.msk.f32.mxu1 %vm2850_vm0, %v2851_v1 }
  0x6e   :  { %2602 = vmatpush3.bf16.msra.mxu1 %v2973_v17  ;;  %2644 = vmatpush3.bf16.msra.mxu0 %v3033_v31 }
  0x6f   :  { %2609 = vmatprep.subr.bf16.mxu1 %v2849_v0  ;;  %2651 = vmatprep.subr.bf16.mxu0 %v2849_v0 }
  0x71   :  { %2429 = vmatmul.mubr.msk.f32.vlgmr.msra.gmra.mrb[4].mxu0 %vm87_vm1, %v1256_v32  ;;  %2352 = vmatmul.mubr.msk.f32.vlgmr.msra.gmra.mrb[2].mxu1 %vm87_vm1, %v63_v33 }
  0x72   :  { %2611 = vmatpush3.bf16.msra.mxu1 %v2965_v14  ;;  %2653 = vmatpush3.bf16.msra.mxu0 %v3025_v28 }
  0x73   :  { %2612 = vmatprep.subr.bf16.mxu1 %v2849_v0  ;;  %2654 = vmatprep.subr.bf16.mxu0 %v2849_v0 }
  0x74   :  { %2450 = vmatprep.mubr.msk.f32.mxu0 %vm2850_vm0, %v2851_v1  ;;  %2373 = vmatprep.mubr.msk.f32.mxu1 %vm2850_vm0, %v2851_v1 }
  0x76   :  { %2614 = vmatpush3.bf16.msra.mxu1 %v2973_v17  ;;  %2656 = vmatpush3.bf16.msra.mxu0 %v3033_v31 }
  0x77   :  { %2621 = vmatprep.subr.bf16.mxu1 %v2849_v0  ;;  %2663 = vmatprep.subr.bf16.mxu0 %v2849_v0 }
  0x79   :  { %2451 = vmatmul.mubr.msk.f32.vlgmr.msra.gmra.mrb[6].mxu0 %vm87_vm1, %v1258_v34  ;;  %2374 = vmatmul.mubr.msk.f32.vlgmr.msra.gmra.mrb[6].mxu1 %vm87_vm1, %v65_v35 }
  0x7a   :  { %2623 = vmatpush3.bf16.msra.mxu1 %v2965_v14  ;;  %2665 = vmatpush3.bf16.msra.mxu0 %v3025_v28 }
  0x7b   :  { %2624 = vmatprep.subr.bf16.mxu1 %v2849_v0  ;;  %2666 = vmatprep.subr.bf16.mxu0 %v2849_v0 }
  0x7c   :  { %2472 = vmatprep.mubr.msk.f32.mxu0 %vm2850_vm0, %v2851_v1  ;;  %2395 = vmatprep.mubr.msk.f32.mxu1 %vm2850_vm0, %v2851_v1 }
  0x7e   :  { %2626 = vmatpush3.bf16.msra.mxu1 %v2973_v17  ;;  %2668 = vmatpush3.bf16.msra.mxu0 %v3033_v31 }
  0x7f   :  { %2633 = vmatprep.subr.bf16.mxu1 %v2849_v0  ;;  %2675 = vmatprep.subr.bf16.mxu0 %v2849_v0 }
  0x81   :  { %2473 = vmatmul.mubr.msk.f32.vlgmr.msra.gmra.mrb[0].mxu0 %vm87_vm1, %v1260_v36  ;;  %2396 = vmatmul.mubr.msk.f32.vlgmr.msra.gmra.mrb[8].mxu1 %vm87_vm1, %v67_v37 }
  0x82   :  { %2635 = vmatpush3.bf16.msra.mxu1 %v2965_v14  ;;  %2677 = vmatpush3.bf16.msra.mxu0 %v3025_v28 }
  0x83   :  { %2636 = vmatprep.subr.bf16.mxu1 %v2849_v0  ;;  %2678 = vmatprep.subr.bf16.mxu0 %v2849_v0 }
  0x84   :  { %2494 = vmatprep.mubr.msk.f32.mxu0 %vm2850_vm0, %v2851_v1  ;;  %2417 = vmatprep.mubr.msk.f32.mxu1 %vm2850_vm0, %v2851_v1 }
  0x86   :  { %2638 = vmatpush3.bf16.msra.mxu1 %v2973_v17  ;;  %2680 = vmatpush3.bf16.msra.mxu0 %v3033_v31 }
  0x87   :  { %2645 = vmatprep.subr.bf16.mxu1 %v2849_v0  ;;  %2687 = vmatprep.subr.bf16.mxu0 %v2849_v0 }
  0x89   :  { %2495 = vmatmul.mubr.msk.f32.vlgmr.msra.gmra.mrb[2].mxu0 %vm87_vm1, %v1262_v38  ;;  %2418 = vmatmul.mubr.msk.f32.vlgmr.msra.gmra.mrb[10].mxu1 %vm87_vm1, %v69_v39 }
  0x8a   :  { %2647 = vmatpush3.bf16.msra.mxu1 %v3025_v28  ;;  %2439 = vmatprep.mubr.msk.f32.mxu1 %vm2850_vm0, %v2851_v1 }
  0x8b   :  { %2648 = vmatprep.subr.bf16.mxu1 %v2849_v0  ;;  %2540 = vmatprep.mubr.msk.f32.mxu0 %vm2850_vm0, %v2851_v1 }
  0x8c   :  { %2689 = vmatpush3.bf16.msra.mxu0 %v2688_v46 }
  0x8d   :  { %2690 = vmatprep.subr.bf16.mxu0 %v2849_v0 }
  0x8e   :  { %2650 = vmatpush3.bf16.msra.mxu1 %v3033_v31 }
  0x8f   :  { %2657 = vmatprep.subr.bf16.mxu1 %v2849_v0 }
  0x90   :  { %2692 = vmatpush3.bf16.msra.mxu0 %v2691_v49 }
  0x91   :  { %2440 = vmatmul.mubr.msk.f32.vlgmr.msra.gmra.mrb[2].mxu1 %vm87_vm1, %v1257_v40  ;;  %2693 = vmatprep.subr.bf16.mxu0 %v2849_v0 }
  0x92   :  { %2659 = vmatpush3.bf16.msra.mxu1 %v3025_v28  ;;  %2461 = vmatprep.mubr.msk.f32.mxu1 %vm2850_vm0, %v2851_v1 }
  0x93   :  { %2660 = vmatprep.subr.bf16.mxu1 %v2849_v0 }
  0x94   :  { %2695 = vmatpush3.bf16.msra.mxu0 %v2694_v52 }
  0x95   :  { %2696 = vmatprep.subr.bf16.mxu0 %v2849_v0 }
  0x96   :  { %2662 = vmatpush3.bf16.msra.mxu1 %v3033_v31 }
  0x97   :  { %2669 = vmatprep.subr.bf16.mxu1 %v2849_v0 }
  0x98   :  { %2698 = vmatpush3.bf16.msra.mxu0 %v2697_v55 }
  0x99   :  { %2462 = vmatmul.mubr.msk.f32.vlgmr.msra.gmra.mrb[6].mxu1 %vm87_vm1, %v1259_v41  ;;  %2699 = vmatprep.subr.bf16.mxu0 %v2849_v0 }
  0x9a   :  { %2671 = vmatpush3.bf16.msra.mxu1 %v3025_v28  ;;  %2483 = vmatprep.mubr.msk.f32.mxu1 %vm2850_vm0, %v2851_v1 }
  0x9b   :  { %2672 = vmatprep.subr.bf16.mxu1 %v2849_v0 }
  0x9c   :  { %2701 = vmatpush3.bf16.msra.mxu0 %v2700_v58 }
  0x9d   :  { %2702 = vmatprep.subr.bf16.mxu0 %v2849_v0 }
  0x9e   :  { %2674 = vmatpush3.bf16.msra.mxu1 %v3033_v31 }
  0x9f   :  { %2681 = vmatprep.subr.bf16.mxu1 %v2849_v0 }
  0xa0   :  { %2704 = vmatpush3.bf16.msra.mxu0 %v2703_v61 }
  0xa1   :  { %2484 = vmatmul.mubr.msk.f32.vlgmr.msra.gmra.mrb[8].mxu1 %vm87_vm1, %v1261_v42  ;;  %2705 = vmatprep.subr.bf16.mxu0 %v2849_v0 }
  0xa2   :  { %2683 = vmatpush3.bf16.msra.mxu1 %v3025_v28  ;;  %2505 = vmatprep.mubr.msk.f32.mxu1 %vm2850_vm0, %v2851_v1  ;;  %v2706_v1 = vpack.c.bf16 %v1954_v63, %v1953_v62 }
  0xa3   :  { %2684 = vmatprep.subr.bf16.mxu1 %v2849_v0 }
  0xa4   :  { %2707 = vmatpush3.bf16.msra.mxu0 %v2706_v1 }
  0xa5   :  { %2708 = vmatprep.subr.bf16.mxu0 %v2849_v0 }
  0xa6   :  { %2686 = vmatpush3.bf16.msra.mxu1 %v3033_v31 }
  0xa8   :  { %2710 = vmatpush3.bf16.msra.mxu0 %v2709_v4 }
  0xa9   :  { %2506 = vmatmul.mubr.msk.f32.vlgmr.msra.gmra.mrb[10].mxu1 %vm87_vm1, %v1263_v43 }
 0x114   :  { %v157_v5 = vpop.f32.mrb[0].mxu1 }
 0x115   :  { %v2254_v6 = vpop.f32.mrb[1].mxu1 }
 0x124   :  { %v303_v7 = vpop.f32.mrb[4].mxu1 }
 0x125   :  { %v2276_v8 = vpop.f32.mrb[5].mxu1 }
 0x144   :  { %v1338_v9 = vpop.f32.mrb[4].mxu0 }
 0x145   :  { %v2711_v10 = vadd.f32 %v1338_v9, %v157_v5  ;;  %v2430_v11 = vpop.f32.mrb[5].mxu0 }
 0x147   :  { %v1862_v0 = vsel %vm1861_vm2, %v2711_v10, -inf }
 0x148   :  { %v1863_v19 = vrot.slane %v1862_v0, 4 }
 0x14a   :  { %v1864_v24 = vmax.f32 %v1862_v0, %v1863_v19 }
 0x14c   :  { %v1484_v12 = vpop.f32.mrb[6].mxu0  ;;  %v1865_v27 = vrot.slane %v1864_v24, 2 }
 0x14d   :  { %v2712_v13 = vadd.f32 %v1484_v12, %v303_v7  ;;  %v2452_v14 = vpop.f32.mrb[7].mxu0 }
 0x14e   :  { %v1866_v34 = vmax.f32 %v1864_v24, %v1865_v27 }
 0x14f   :  { %v1876_v15 = vsel %vm1861_vm2, %v2712_v13, -inf }
 0x150   :  { %v1877_v18 = vrot.slane %v1876_v15, 4  ;;  %v1867_v40 = vrot.slane %v1866_v34, 1 }
 0x152   :  { %v1878_v20 = vmax.f32 %v1876_v15, %v1877_v18  ;;  %v1868_v49 = vmax.f32 %v1866_v34, %v1867_v40 }
 0x154   :  { %v1630_v16 = vpop.f32.mrb[0].mxu0  ;;  %v1879_v25 = vrot.slane %v1878_v20, 2  ;;  %v1925_v58 = vadd.f32 %v3134_v50, %v1868_v49  ;;  %v2106_v49 = vld [vmem:[%s3165_s4] ss:$0 sm:$0xff] }
 0x155   :  { %v2474_v17 = vpop.f32.mrb[1].mxu0  ;;  %v1890_v21 = vsel %vm1861_vm2, %v1630_v16, -inf }
 0x156   :  { %v1891_v26 = vrot.slane %v1890_v21, 4  ;;  %v1880_v28 = vmax.f32 %v1878_v20, %v1879_v25  ;;  %v1933_v6 = vmax.f32 %v1925_v58, 0.0 }
 0x158   :  { %v1892_v29 = vmax.f32 %v1890_v21, %v1891_v26  ;;  %v1881_v36 = vrot.slane %v1880_v28, 1 }
 0x15a   :  { %v1893_v37 = vrot.slane %v1892_v29, 2  ;;  %v1882_v42 = vmax.f32 %v1880_v28, %v1881_v36 }
 0x15c   :  { %v1776_v22 = vpop.f32.mrb[2].mxu0  ;;  %v1894_v43 = vmax.f32 %v1892_v29, %v1893_v37  ;;  %v1927_v53 = vadd.f32 %v3134_v50, %v1882_v42 }
 0x15d   :  { %v2496_v23 = vpop.f32.mrb[3].mxu0  ;;  %v1904_v30 = vsel %vm1861_vm2, %v1776_v22, -inf }
 0x15e   :  { %v1905_v38 = vrot.slane %v1904_v30, 4  ;;  %v1895_v54 = vrot.slane %v1894_v43, 1  ;;  %v1935_v61 = vmax.f32 %v1927_v53, 0.0 }
 0x160   :  { %v1906_v44 = vmax.f32 %v1904_v30, %v1905_v38  ;;  %v1896_v62 = vmax.f32 %v1894_v43, %v1895_v54  ;;  %v1975_v10 = vrot.slane %v1935_v61, 6 }
 0x162   :  { %v1907_v55 = vrot.slane %v1906_v44, 2  ;;  %v1929_v11 = vadd.f32 %v3134_v50, %v1896_v62 }
 0x164   :  { %v1411_v31 = vpop.f32.mrb[2].mxu1  ;;  %v1908_v63 = vmax.f32 %v1906_v44, %v1907_v55  ;;  %v1937_v18 = vmax.f32 %v1929_v11, 0.0 }
 0x165   :  { %v1869_v32 = vsel %vm1861_vm2, %v1411_v31, -inf  ;;  %v2441_v33 = vpop.f32.mrb[3].mxu1 }
 0x166   :  { %v1870_v35 = vrot.slane %v1869_v32, 4  ;;  %v1909_v12 = vrot.slane %v1908_v63, 1  ;;  %v1981_v28 = vrot.slane %v1937_v18, 4 }
 0x168   :  { %v1871_v39 = vmax.f32 %v1869_v32, %v1870_v35  ;;  %v1910_v19 = vmax.f32 %v1908_v63, %v1909_v12 }
 0x16a   :  { %v1872_v41 = vrot.slane %v1871_v39, 2  ;;  %v1931_v29 = vadd.f32 %v3134_v50, %v1910_v19 }
 0x16c   :  { %v1873_v45 = vmax.f32 %v1871_v39, %v1872_v41  ;;  %v1557_v46 = vpop.f32.mrb[6].mxu1  ;;  %v1939_v36 = vmax.f32 %v1931_v29, 0.0 }
 0x16d   :  { %v1883_v47 = vsel %vm1861_vm2, %v1557_v46, -inf  ;;  %v2463_v48 = vpop.f32.mrb[7].mxu1 }
 0x16e   :  { %v1874_v51 = vrot.slane %v1873_v45, 1  ;;  %v1884_v52 = vrot.slane %v1883_v47, 4  ;;  %v1987_v41 = vrot.slane %v1939_v36, 2 }
 0x170   :  { %v1875_v56 = vmax.f32 %v1873_v45, %v1874_v51  ;;  %v1885_v57 = vmax.f32 %v1883_v47, %v1884_v52 }
 0x172   :  { %v1926_v59 = vadd.f32 %v3134_v50, %v1875_v56  ;;  %v1886_v60 = vrot.slane %v1885_v57, 2 }
 0x174   :  { %v1934_v1 = vmax.f32 %v1926_v59, 0.0  ;;  %v1887_v2 = vmax.f32 %v1885_v57, %v1886_v60  ;;  %v1703_v3 = vpop.f32.mrb[8].mxu1 }
 0x175   :  { %v1897_v4 = vsel %vm1861_vm2, %v1703_v3, -inf  ;;  %v2485_v5 = vpop.f32.mrb[9].mxu1 }
 0x176   :  { %v1972_v7 = vrot.slane %v1934_v1, 7  ;;  %v1888_v8 = vrot.slane %v1887_v2, 1  ;;  %v1898_v9 = vrot.slane %v1897_v4, 4 }
 0x178   :  { %v1974_v13 = vsel %vm1973_vm3, %v1972_v7, %v1933_v6  ;;  %v1889_v14 = vmax.f32 %v1887_v2, %v1888_v8  ;;  %v1899_v15 = vmax.f32 %v1897_v4, %v1898_v9 }
 0x179   :  { %v1977_v16 = vsel %vm1976_vm4, %v1975_v10, %v1974_v13 }
 0x17a   :  { %v1928_v17 = vadd.f32 %v3134_v50, %v1889_v14  ;;  %v1900_v0 = vrot.slane %v1899_v15, 2 }
 0x17c   :  { %v1936_v20 = vmax.f32 %v1928_v17, 0.0  ;;  %v1901_v21 = vmax.f32 %v1899_v15, %v1900_v0  ;;  %v1849_v22 = vpop.f32.mrb[10].mxu1 }
 0x17d   :  { %v1911_v23 = vsel %vm1861_vm2, %v1849_v22, -inf  ;;  %v2507_v24 = vpop.f32.mrb[11].mxu1 }
 0x17e   :  { %v1978_v25 = vrot.slane %v1936_v20, 5  ;;  %v1902_v26 = vrot.slane %v1901_v21, 1  ;;  %v1912_v27 = vrot.slane %v1911_v23, 4 }
 0x180   :  { %v1903_v30 = vmax.f32 %v1901_v21, %v1902_v26  ;;  %v1913_v31 = vmax.f32 %v1911_v23, %v1912_v27  ;;  %v1980_v32 = vsel %vm1979_vm5, %v1978_v25, %v1977_v16 }
 0x181   :  { %v1983_v33 = vsel %vm1982_vm6, %v1981_v28, %v1980_v32 }
 0x182   :  { %v1930_v34 = vadd.f32 %v3134_v50, %v1903_v30  ;;  %v1914_v35 = vrot.slane %v1913_v31, 2 }
 0x184   :  { %v1938_v37 = vmax.f32 %v1930_v34, 0.0  ;;  %v1915_v38 = vmax.f32 %v1913_v31, %v1914_v35 }
 0x186   :  { %v1984_v39 = vrot.slane %v1938_v37, 3  ;;  %v1916_v40 = vrot.slane %v1915_v38, 1 }
 0x188   :  { %v1917_v42 = vmax.f32 %v1915_v38, %v1916_v40  ;;  %v1986_v43 = vsel %vm1985_vm7, %v1984_v39, %v1983_v33 }
 0x189   :  { %v1989_v44 = vsel %vm1988_vm8, %v1987_v41, %v1986_v43 }
 0x18a   :  { %v1932_v45 = vadd.f32 %v3134_v50, %v1917_v42 }
 0x18c   :  { %v1940_v46 = vmax.f32 %v1932_v45, 0.0 }
 0x18e   :  { %v1990_v47 = vrot.slane %v1940_v46, 1 }
 0x190   :  { %v1992_v48 = vsel %vm1991_vm9, %v1990_v47, %v1989_v44 }
 0x191   :  { %2541 = vmatmul.mubr.f32.vlgmr.msra.gmra.mrb[8].mxu0 %v1992_v48 }
 0x264   :  { %v2060_v51 = vpop.f32.mrb[8].mxu0 }
 0x265   :  { %v2061_v52 = vadd.f32 %v2106_v49, %v2060_v51  ;;  %v2542_v53 = vpop.f32.mrb[9].mxu0 }
 0x267   :  { %2064 = vst [vmem:[#allocation8] sm:$0xff] %v2061_v52 }
 0x268   :  { %2827 = shalt.err (!%p2824_p0)
}
 0x269   :  { %s2828_s11 = scalar_lea.hbm %s3166_s5, 128 }
 0x26a   :  { %p2829_p1 = scmp.ne.s32.totalorder %s3166_s5, %s2828_s11  ;;  %p2832_p2 = scmp.lt.u32.totalorder %s2828_s11, %s3166_s5 }
 0x26c   :  { %p2834_p3 = pnand %p2832_p2, %p2829_p1 }
 0x26e   :  { %2837 = shalt.err (!%p2834_p3)
}
 0x26f   :  { %2074 = dma.vmem_to_hbm [thread:$0]  %s2072_s7, 128, %s3166_s5, [#allocation4]  }
 0x270   :  { %2842 = dma.done.wait [#allocation4], 128  }
 0x271   :  { %2843 = vsyncadd [#allocation4], 4294967168 }
 0x272   :  { %2078 = vsyncpa [#allocation3], 1 }
 0x273   :  { %2079 = vsyncpa [#allocation6], 1 }
 0x274   :  { %2080 = vsyncpa [#allocation4], 1 }

</bundles_post_ra>
